<compile_context>
chip_gen: v7x
topology: tpu7x:2x2x1
jax: 0.10.0
libtpu: 0.0.40
codegen_flags: <defaults>
</compile_context>

<pallas_src>
import jax
import jax.numpy as jnp
from jax.experimental import pallas as pl
from jax.experimental.pallas import tpu as pltpu


# --------------------------------------------------------------------------
# Tiling helpers (lane-dense packing)
# --------------------------------------------------------------------------
_LANE = 512            # 4 x 128 lanes -> unmasked vst
_MAX_TILE_ROWS = 1024  # 1024 x 512 x 4B = 2 MiB per f32 stream per buffer
_ROW_ALIGN = 16        # sublane alignment valid for both f32 and bf16 slabs

_PARAMS_1D = pltpu.CompilerParams(
    dimension_semantics=("parallel",), vmem_limit_bytes=32 * 1024 * 1024)
_PARAMS_2D = pltpu.CompilerParams(
    dimension_semantics=("parallel", "arbitrary"),
    vmem_limit_bytes=32 * 1024 * 1024)


def _round_up(x, m):
    return (x + m - 1) // m * m


def _tiling_for(n):
    """Return (tile_rows, padded_rows) for n flattened elements."""
    rows = max(1, -(-n // _LANE))
    rows = _round_up(rows, _ROW_ALIGN)
    if rows <= _MAX_TILE_ROWS:
        return rows, rows
    k = -(-rows // _MAX_TILE_ROWS)                  # number of row tiles
    tile = _round_up(-(-rows // k), _ROW_ALIGN)
    return tile, tile * k


def _largest_divisor_le(n, cap):
    cap = max(1, min(cap, n))
    for d in range(cap, 0, -1):
        if n % d == 0:
            return d
    return 1


def _pack2d(a, rows_pad, lane=_LANE):
    """Flatten into a lane-dense (rows_pad, lane) slab in the array's native
    dtype.  Pads only when the element count is ragged."""
    flat = a.reshape(-1)
    total = rows_pad * lane
    if total != flat.shape[0]:
        flat = jnp.pad(flat, (0, total - flat.shape[0]))
    return flat.reshape(rows_pad, lane)


# --------------------------------------------------------------------------
# TPU hardware-PRNG capability, resolved once at import time
# --------------------------------------------------------------------------
def _probe_tpu_prng() -> bool:
    if not (hasattr(pltpu, "prng_seed") and hasattr(pltpu, "stateful_normal")):
        return False

    def _k(o_ref):
        pltpu.prng_seed(12345)
        o_ref[...] = pltpu.stateful_normal(o_ref.shape, jnp.float32)

    try:
        out = pl.pallas_call(
            _k, out_shape=jax.ShapeDtypeStruct((8, 128), jnp.float32))()
        jax.block_until_ready(out)
        return True
    except Exception:
        return False


_HAS_TPU_PRNG = _probe_tpu_prng()


# --------------------------------------------------------------------------
# Pallas kernels
# --------------------------------------------------------------------------
def _ddim_step_kernel(coef_ref, eps_ref, x_ref, out_ref):
    # coef (SMEM): [0]=A, [1]=B ;  out = A*x + B*eps   (deterministic step)
    x = x_ref[...].astype(jnp.float32)
    e = eps_ref[...].astype(jnp.float32)
    out_ref[...] = (coef_ref[0] * x + coef_ref[1] * e).astype(out_ref.dtype)


def _ddim_step_noise_kernel(coef_ref, eps_ref, x_ref, noise_ref, out_ref):
    # coef (SMEM): [0]=A, [1]=B, [2]=eta*sqrt(var)
    x = x_ref[...].astype(jnp.float32)
    e = eps_ref[...].astype(jnp.float32)
    n = noise_ref[...].astype(jnp.float32)
    out_ref[...] = (coef_ref[0] * x + coef_ref[1] * e
                    + coef_ref[2] * n).astype(out_ref.dtype)


def _ddim_step_rng_kernel(coef_ref, seed_ref, eps_ref, x_ref, out_ref):
    # Same as above, but variance noise is drawn in-kernel (never hits HBM).
    pltpu.prng_seed(seed_ref[0] + pl.program_id(0))
    n = pltpu.stateful_normal(out_ref.shape, jnp.float32)
    x = x_ref[...].astype(jnp.float32)
    e = eps_ref[...].astype(jnp.float32)
    out_ref[...] = (coef_ref[0] * x + coef_ref[1] * e
                    + coef_ref[2] * n).astype(out_ref.dtype)


def _zs_from_xts_kernel(coef_ref, xt_ref, xtm1_ref, eps_ref, z_ref, xtm1_out_ref):
    # coef (SMEM): [0]=A, [1]=B, [2]=sigma, [3]=1/sigma
    xt = xt_ref[...].astype(jnp.float32)
    xtm1 = xtm1_ref[...].astype(jnp.float32)
    eps = eps_ref[...].astype(jnp.float32)
    mu = coef_ref[0] * xt + coef_ref[1] * eps
    z = (xtm1 - mu) * coef_ref[3]
    z_ref[...] = z.astype(z_ref.dtype)
    xtm1_out_ref[...] = (mu + coef_ref[2] * z).astype(xtm1_out_ref.dtype)   # numerical_fix


def _sample_xts_rng_kernel(seed_ref, a_ref, b_ref, x0_ref, xts_ref, noise_ref):
    # grid = (row_tiles, step_blocks); x0 block resident across the step axis.
    j = pl.program_id(0)
    i = pl.program_id(1)
    pltpu.prng_seed(seed_ref[0] + i * pl.num_programs(0) + j)
    x0 = x0_ref[...].astype(jnp.float32)
    s_blk = xts_ref.shape[0]
    blk = xts_ref.shape[1:]
    for s in range(s_blk):                       # static unroll over timesteps
        t = i * s_blk + s
        nz = pltpu.stateful_normal(blk, jnp.float32)
        noise_ref[s] = nz.astype(noise_ref.dtype)
        xts_ref[s] = (x0 * a_ref[t] + nz * b_ref[t]).astype(xts_ref.dtype)


def _sample_xts_rng_xonly_kernel(seed_ref, a_ref, b_ref, x0_ref, xts_ref):
    # Same PRNG stream as above, but the noise is never written back to HBM.
    j = pl.program_id(0)
    i = pl.program_id(1)
    pltpu.prng_seed(seed_ref[0] + i * pl.num_programs(0) + j)
    x0 = x0_ref[...].astype(jnp.float32)
    s_blk = xts_ref.shape[0]
    blk = xts_ref.shape[1:]
    for s in range(s_blk):
        t = i * s_blk + s
        nz = pltpu.stateful_normal(blk, jnp.float32)
        xts_ref[s] = (x0 * a_ref[t] + nz * b_ref[t]).astype(xts_ref.dtype)


def _sample_xts_hostnoise_kernel(a_ref, b_ref, x0_ref, noise_ref, xts_ref):
    # Fallback when the TPU hardware PRNG is unavailable: noise streamed in.
    i = pl.program_id(1)
    x0 = x0_ref[...].astype(jnp.float32)
    s_blk = xts_ref.shape[0]
    for s in range(s_blk):
        t = i * s_blk + s
        xts_ref[s] = (x0 * a_ref[t]
                      + noise_ref[s].astype(jnp.float32) * b_ref[t]).astype(xts_ref.dtype)


# --------------------------------------------------------------------------
# Thin pallas_call helper: tiled, pipelined fused elementwise
# --------------------------------------------------------------------------
def _fused_elementwise(kernel, scalars, arrays, num_outputs):
    orig_shape = arrays[0].shape
    out_dtype = arrays[0].dtype
    n = int(arrays[0].size)
    tile_rows, rows_pad = _tiling_for(n)
    packed = [_pack2d(a, rows_pad) for a in arrays]

    blk = pl.BlockSpec((tile_rows, _LANE), lambda i, *_: (i, 0))
    one = jax.ShapeDtypeStruct((rows_pad, _LANE), out_dtype)
    out_shape = one if num_outputs == 1 else tuple([one] * num_outputs)
    out_specs = blk if num_outputs == 1 else tuple([blk] * num_outputs)

    res = pl.pallas_call(
        kernel,
        out_shape=out_shape,
        grid_spec=pltpu.PrefetchScalarGridSpec(
            num_scalar_prefetch=len(scalars),
            grid=(rows_pad // tile_rows,),
            in_specs=[blk] * len(packed),
            out_specs=out_specs),
        compiler_params=_PARAMS_1D,
    )(*scalars, *packed)

    exact = (n == rows_pad * _LANE)

    def _unpack(r):
        if exact:
            return r.reshape(orig_shape)
        return r.reshape(-1)[:n].reshape(orig_shape)

    if num_outputs == 1:
        return _unpack(res)
    return tuple(_unpack(r) for r in res)


# --------------------------------------------------------------------------
# Wrapper (JAX/Pallas port of CelebAHQWrapper's concrete scheduler math)
# --------------------------------------------------------------------------
class CelebAHQWrapperPallas:
    def __init__(self, num_train_timesteps: int = 1000,
                 num_inference_steps: int = 50,
                 beta_start: float = 1e-4, beta_end: float = 2e-2):
        self.num_train_timesteps = num_train_timesteps
        self.num_inference_steps = num_inference_steps
        T = num_train_timesteps
        # Deterministic DDIM linear beta schedule (stand-in for the hub config).
        betas = jnp.linspace(beta_start, beta_end, T, dtype=jnp.float32)
        acp = jnp.cumprod(1.0 - betas)
        self.alphas_cumprod = acp
        self.final_alpha_cumprod = acp[0]

        # Per-timestep coefficient tables (perf: per-step calls only gather).
        step = T // num_inference_steps
        prev_t = jnp.arange(T, dtype=jnp.int32) - step
        a_t = acp
        a_prev = jnp.where(prev_t >= 0, acp[jnp.clip(prev_t, 0, T - 1)],
                           self.final_alpha_cumprod)
        var = (1.0 - a_prev) / (1.0 - a_t) * (1.0 - a_t / a_prev)
        self._a_prev_tbl = a_prev
        self._var_tbl = var
        self._A_tbl = jnp.sqrt(a_prev / a_t)
        self._sqrt_1m_a_t_tbl = jnp.sqrt(1.0 - a_t)
        self._one_m_a_prev_tbl = 1.0 - a_prev
        self._sqrt_var_tbl = jnp.sqrt(var)
        self._sqrt_recipm1_tbl = jnp.sqrt(1.0 / acp - 1.0)

    # ---- trivial scalar helpers / API parity ----
    def get_sr(self) -> int:
        return 16000

    def encode_text(self, *args, **kwargs):
        return (None, None, None)

    def get_sigma(self, timestep):
        return self._sqrt_recipm1_tbl[timestep]

    def get_alpha_prod_t_prev(self, prev_timestep):
        return jnp.where(prev_timestep >= 0,
                         self.alphas_cumprod[jnp.maximum(prev_timestep, 0)],
                         self.final_alpha_cumprod)

    def get_variance(self, timestep, prev_timestep):
        a_t = self.alphas_cumprod[timestep]
        a_prev = self.get_alpha_prod_t_prev(prev_timestep)
        return (1.0 - a_prev) / (1.0 - a_t) * (1.0 - a_t / a_prev)

    def get_noise_shape(self, x0, num_steps):
        return (num_steps, x0.shape[-3], x0.shape[-2], x0.shape[-1])

    def _step_scalars(self, timestep):
        t = jnp.asarray(timestep, jnp.int32)
        return self.alphas_cumprod[t], self._a_prev_tbl[t], self._var_tbl[t]

    def _step_coefs(self, timestep, eta):
        # prev = A*sample + B*eps (+ eta*sqrt(var)*noise)   [epsilon prediction]
        t = jnp.asarray(timestep, jnp.int32)
        A = self._A_tbl[t]
        dir_c = jnp.sqrt(self._one_m_a_prev_tbl[t] - eta * self._var_tbl[t])
        B = dir_c - A * self._sqrt_1m_a_t_tbl[t]
        sigma = eta * self._sqrt_var_tbl[t]
        return A, B, sigma

    # ---- reverse_step_with_custom_noise (epsilon prediction) ----
    def reverse_step_with_custom_noise(self, model_output, timestep, sample,
                                       variance_noise=None, eta: float = 0.0,
                                       key=None):
        A, B, sigma = self._step_coefs(timestep, eta)
        if eta <= 0:
            coefs = jnp.stack([A, B])
            return _fused_elementwise(_ddim_step_kernel, [coefs],
                                      [model_output, sample], 1)

        coefs = jnp.stack([A, B, sigma])
        if variance_noise is not None:
            return _fused_elementwise(_ddim_step_noise_kernel, [coefs],
                                      [model_output, sample, variance_noise], 1)

        if key is None:
            # TODO(synk): torch draws here from the implicit global RNG; JAX
            # needs an explicit key, so fail loudly instead of skipping noise.
            raise ValueError("eta > 0 with variance_noise=None requires `key`.")

        if _HAS_TPU_PRNG:
            seed = jax.random.randint(key, (1,), 0, jnp.iinfo(jnp.int32).max,
                                      dtype=jnp.int32)
            return _fused_elementwise(_ddim_step_rng_kernel, [coefs, seed],
                                      [model_output, sample], 1)

        variance_noise = jax.random.normal(key, model_output.shape, jnp.float32)
        return _fused_elementwise(_ddim_step_noise_kernel, [coefs],
                                  [model_output, sample, variance_noise], 1)

    # ---- get_zs_from_xts (epsilon prediction) ----
    def get_zs_from_xts(self, xt, xtm1, noise_pred, t, eta: float = 0.0,
                        numerical_fix: bool = True, **kwargs):
        # NOTE: like the torch reference, eta == 0 (or zero variance) divides
        # by zero here -- callers use eta > 0 on this path.
        A, B, sigma = self._step_coefs(t, eta)
        coefs = jnp.stack([A, B, sigma, 1.0 / sigma])
        z, xtm1_fixed = _fused_elementwise(_zs_from_xts_kernel, [coefs],
                                           [xt, xtm1, noise_pred], 2)
        return (z, xtm1_fixed if numerical_fix else xtm1, None)

    # ---- sample_xts_from_x0 ----
    def sample_xts_from_x0(self, key, x0, num_inference_steps: int = 50,
                           return_noise: bool = True):
        C, H, W = x0.shape
        S = num_inference_steps
        step = self.num_train_timesteps // S
        t_asc = jnp.arange(0, S, dtype=jnp.int32) * step     # ascending timesteps
        ab = self.alphas_cumprod[t_asc]
        a = jnp.concatenate([jnp.ones((1,), jnp.float32), jnp.sqrt(ab)])
        b = jnp.concatenate([jnp.zeros((1,), jnp.float32), jnp.sqrt(1.0 - ab)])

        n = C * H * W
        row_tile, rows_pad = _tiling_for(n)
        num_row_blocks = rows_pad // row_tile
        block_bytes = row_tile * _LANE * 4
        s_blk = _largest_divisor_le(S + 1, max(1, (2 * 1024 * 1024) // block_bytes))
        num_step_blocks = (S + 1) // s_blk
        grid = (num_row_blocks, num_step_blocks)

        x0p = _pack2d(x0, rows_pad)
        exact = (n == rows_pad * _LANE)

        x0_spec = pl.BlockSpec((row_tile, _LANE), lambda j, i, *_: (j, 0))
        out_spec = pl.BlockSpec((s_blk, row_tile, _LANE),
                                lambda j, i, *_: (i, j, 0))
        xts_sds = jax.ShapeDtypeStruct((S + 1, rows_pad, _LANE), x0.dtype)
        noise_sds = jax.ShapeDtypeStruct((S + 1, rows_pad, _LANE), jnp.float32)

        def _unpack(p):
            if exact:
                return p.reshape(S + 1, C, H, W)
            return p.reshape(S + 1, -1)[:, :n].reshape(S + 1, C, H, W)

        if _HAS_TPU_PRNG:
            seed = jax.random.randint(key, (1,), 0, jnp.iinfo(jnp.int32).max,
                                      dtype=jnp.int32)
            if return_noise:
                xts_p, noise_p = pl.pallas_call(
                    _sample_xts_rng_kernel,
                    out_shape=(xts_sds, noise_sds),
                    grid_spec=pltpu.PrefetchScalarGridSpec(
                        num_scalar_prefetch=3, grid=grid,
                        in_specs=[x0_spec],
                        out_specs=(out_spec, out_spec)),
                    compiler_params=_PARAMS_2D,
                )(seed, a, b, x0p)
                return _unpack(xts_p), _unpack(noise_p), a, b
            xts_p = pl.pallas_call(
                _sample_xts_rng_xonly_kernel,
                out_shape=xts_sds,
                grid_spec=pltpu.PrefetchScalarGridSpec(
                    num_scalar_prefetch=3, grid=grid,
                    in_specs=[x0_spec],
                    out_specs=out_spec),
                compiler_params=_PARAMS_2D,
            )(seed, a, b, x0p)
            return _unpack(xts_p), None, a, b

        # Fallback: host-generated noise streamed through the kernel.
        noise_p = jax.random.normal(key, (S + 1, rows_pad, _LANE), jnp.float32)
        xts_p = pl.pallas_call(
            _sample_xts_hostnoise_kernel,
            out_shape=xts_sds,
            grid_spec=pltpu.PrefetchScalarGridSpec(
                num_scalar_prefetch=2, grid=grid,
                in_specs=[x0_spec, out_spec],
                out_specs=out_spec),
            compiler_params=_PARAMS_2D,
        )(a, b, x0p, noise_p)
        return _unpack(xts_p), (_unpack(noise_p) if return_noise else None), a, b

    # ---- pretrained-network methods: not reproducible in-script ----
    def unet_forward(self, *args, **kwargs):
        # TODO(synk): diffusers UNet2DModel forward (hub checkpoint) not reproduced.
        raise NotImplementedError

    def vae_encode(self, x):
        # TODO(synk): pretrained VQModel encoder not reproduced.
        raise NotImplementedError

    def vae_decode(self, x):
        # TODO(synk): pretrained VQModel decoder not reproduced.
        raise NotImplementedError


# --------------------------------------------------------------------------
# Pure-JAX references for correctness checks
# --------------------------------------------------------------------------
def _ref_reverse_step(w, model_output, timestep, sample, variance_noise, eta):
    a_t, a_prev, var = w._step_scalars(timestep)
    pred_x0 = (sample - jnp.sqrt(1.0 - a_t) * model_output) / jnp.sqrt(a_t)
    direction = jnp.sqrt(1.0 - a_prev - eta * var) * model_output
    prev_sample = jnp.sqrt(a_prev) * pred_x0 + direction
    if eta > 0:
        prev_sample = prev_sample + eta * jnp.sqrt(var) * variance_noise
    return prev_sample


def _ref_zs(w, xt, xtm1, noise_pred, t, eta):
    a_t, a_prev, var = w._step_scalars(t)
    pred_x0 = (xt - jnp.sqrt(1.0 - a_t) * noise_pred) / jnp.sqrt(a_t)
    mu = jnp.sqrt(a_prev) * pred_x0 + jnp.sqrt(1.0 - a_prev - eta * var) * noise_pred
    z = (xtm1 - mu) / (eta * jnp.sqrt(var))
    return z, mu + eta * jnp.sqrt(var) * z


# --------------------------------------------------------------------------
if __name__ == "__main__":
    key = jax.random.PRNGKey(0)
    k1, k2, k3, k4, k5, k6 = jax.random.split(key, 6)

    B, C, H, W = 2, 3, 16, 16           # small NCHW latents
    wrapper = CelebAHQWrapperPallas()

    sample = jax.random.normal(k1, (B, C, H, W), jnp.float32)
    model_output = jax.random.normal(k2, (B, C, H, W), jnp.float32)
    variance_noise = jax.random.normal(k3, (B, C, H, W), jnp.float32)
    timestep = 500
    eta = 1.0

    # 1) noisy DDIM reverse step (explicit noise streamed from HBM)
    prev_sample = jax.block_until_ready(
        wrapper.reverse_step_with_custom_noise(model_output, timestep, sample,
                                               variance_noise, eta=eta))
    ref_prev = _ref_reverse_step(wrapper, model_output, timestep, sample,
                                 variance_noise, eta)
    assert jnp.allclose(prev_sample, ref_prev, rtol=1e-5, atol=1e-5)

    # 1b) deterministic reverse step (eta = 0, only two streams)
    prev_det = jax.block_until_ready(
        wrapper.reverse_step_with_custom_noise(model_output, timestep, sample,
                                               eta=0.0))
    ref_det = _ref_reverse_step(wrapper, model_output, timestep, sample,
                                jnp.zeros_like(sample), 0.0)
    assert jnp.allclose(prev_det, ref_det, rtol=1e-5, atol=1e-5)

    # 1c) noisy reverse step with in-kernel hardware PRNG (noise never in HBM)
    prev_rng = jax.block_until_ready(
        wrapper.reverse_step_with_custom_noise(model_output, timestep, sample,
                                               eta=eta, key=k6))
    _, _, var = wrapper._step_scalars(timestep)
    sigma = eta * jnp.sqrt(var)
    ref_mean = _ref_reverse_step(wrapper, model_output, timestep, sample,
                                 jnp.zeros_like(sample), eta)
    implied_noise = (prev_rng - ref_mean) / sigma
    assert bool(jnp.all(jnp.isfinite(prev_rng)))
    assert abs(float(jnp.mean(implied_noise))) < 0.2
    assert abs(float(jnp.std(implied_noise)) - 1.0) < 0.2

    # 2) sample_xts_from_x0 (in-kernel RNG; noise returned for the check)
    x0 = jax.random.normal(k4, (C, H, W), jnp.float32)
    xts, noise, a_c, b_c = wrapper.sample_xts_from_x0(k5, x0,
                                                      num_inference_steps=50)
    xts = jax.block_until_ready(xts)
    ref_xts = (x0[None] * a_c[:, None, None, None]
               + noise * b_c[:, None, None, None])
    assert jnp.allclose(xts, ref_xts, rtol=1e-5, atol=1e-5)

    # 2b) xts-only variant (no noise write-back) reproduces the same stream
    xts_only, _, _, _ = wrapper.sample_xts_from_x0(k5, x0,
                                                   num_inference_steps=50,
                                                   return_noise=False)
    xts_only = jax.block_until_ready(xts_only)
    assert jnp.allclose(xts_only, xts, rtol=1e-5, atol=1e-5)

    # 3) get_zs_from_xts kernel (uses two consecutive xts entries)
    xt, xtm1 = xts[2], xts[1]
    noise_pred = model_output[0]
    z, xtm1_fix, _ = wrapper.get_zs_from_xts(xt, xtm1, noise_pred, timestep,
                                             eta=eta)
    z = jax.block_until_ready(z)
    ref_z, ref_fix = _ref_zs(wrapper, xt, xtm1, noise_pred, timestep, eta)
    assert jnp.allclose(z, ref_z, rtol=1e-4, atol=1e-4)
    assert jnp.allclose(xtm1_fix, ref_fix, rtol=1e-4, atol=1e-4)

    print("KERNEL_OK")
</pallas_src>

<mosaic_0001>
module attributes {stable_mosaic.version = 11 : i64} {
  func.func @_ddim_step_noise_kernel(%arg0: i32, %arg1: memref<3xf32, #tpu.memory_space<smem>>, %arg2: memref<16x512xf32, #tpu.memory_space<vmem>>, %arg3: memref<16x512xf32, #tpu.memory_space<vmem>>, %arg4: memref<16x512xf32, #tpu.memory_space<vmem>>, %arg5: memref<16x512xf32, #tpu.memory_space<vmem>>) attributes {dimension_semantics = [#tpu.dimension_semantics<parallel>], iteration_bounds = array<i64: 1>, scalar_prefetch = 1 : i64, scratch_operands = 0 : i64, tpu.core_type = #tpu.core_type<tc>, window_params = [{transform_indices = @transform_0, window_bounds = array<i64: 16, 512>}, {transform_indices = @transform_1, window_bounds = array<i64: 16, 512>}, {transform_indices = @transform_2, window_bounds = array<i64: 16, 512>}, {transform_indices = @transform_3, window_bounds = array<i64: 16, 512>}]} {
    %c0 = arith.constant 0 : index
    %c0_0 = arith.constant 0 : index
    %0 = vector.load %arg3[%c0, %c0_0] : memref<16x512xf32, #tpu.memory_space<vmem>>, vector<16x512xf32>
    %c0_1 = arith.constant 0 : index
    %c0_2 = arith.constant 0 : index
    %1 = vector.load %arg2[%c0_1, %c0_2] : memref<16x512xf32, #tpu.memory_space<vmem>>, vector<16x512xf32>
    %c0_3 = arith.constant 0 : index
    %c0_4 = arith.constant 0 : index
    %2 = vector.load %arg4[%c0_3, %c0_4] : memref<16x512xf32, #tpu.memory_space<vmem>>, vector<16x512xf32>
    %c0_5 = arith.constant 0 : index
    %3 = memref.load %arg1[%c0_5] : memref<3xf32, #tpu.memory_space<smem>>
    %4 = vector.broadcast %3 : f32 to vector<16x512xf32>
    %5 = arith.mulf %4, %0 : vector<16x512xf32>
    %c1 = arith.constant 1 : index
    %6 = memref.load %arg1[%c1] : memref<3xf32, #tpu.memory_space<smem>>
    %7 = vector.broadcast %6 : f32 to vector<16x512xf32>
    %8 = arith.mulf %7, %1 : vector<16x512xf32>
    %9 = arith.addf %5, %8 : vector<16x512xf32>
    %c2 = arith.constant 2 : index
    %10 = memref.load %arg1[%c2] : memref<3xf32, #tpu.memory_space<smem>>
    %11 = vector.broadcast %10 : f32 to vector<16x512xf32>
    %12 = arith.mulf %11, %2 : vector<16x512xf32>
    %13 = arith.addf %9, %12 : vector<16x512xf32>
    %c0_6 = arith.constant 0 : index
    %c0_7 = arith.constant 0 : index
    %14 = vector.load %arg5[%c0_6, %c0_7] : memref<16x512xf32, #tpu.memory_space<vmem>>, vector<16x512xf32>
    tpu.vector_store %arg5[%c0_6, %c0_7], %13 {strides = array<i32>} : memref<16x512xf32, #tpu.memory_space<vmem>>, vector<16x512xf32>,
    return
  }
  func.func @transform_0(%arg0: i32, %arg1: memref<3xf32, #tpu.memory_space<smem>>) -> (i32, i32) {
    %c0_i32 = arith.constant 0 : i32
    %c0_i32_0 = arith.constant 0 : i32
    return %arg0, %c0_i32 : i32, i32
  }
  func.func @transform_1(%arg0: i32, %arg1: memref<3xf32, #tpu.memory_space<smem>>) -> (i32, i32) {
    %c0_i32 = arith.constant 0 : i32
    %c0_i32_0 = arith.constant 0 : i32
    return %arg0, %c0_i32 : i32, i32
  }
  func.func @transform_2(%arg0: i32, %arg1: memref<3xf32, #tpu.memory_space<smem>>) -> (i32, i32) {
    %c0_i32 = arith.constant 0 : i32
    %c0_i32_0 = arith.constant 0 : i32
    return %arg0, %c0_i32 : i32, i32
  }
  func.func @transform_3(%arg0: i32, %arg1: memref<3xf32, #tpu.memory_space<smem>>) -> (i32, i32) {
    %c0_i32 = arith.constant 0 : i32
    %c0_i32_0 = arith.constant 0 : i32
    return %arg0, %c0_i32 : i32, i32
  }
}

</mosaic_0001>

<bundles_post_ra>
// kernel: tpu_custom_call.1
= control target key start
LH: loop header
LB: loop body
LE: loop exit
PB: predicated region body
PF: predicated region fallthrough
CT: control target
= control target key end

     0   :  { %s383_s0 = inlined_call_operand.hbm [shape: f32[3], index: 0, kind: input, shape index: {}]   ;;  %s384_s1 = inlined_call_operand.hbm [shape: f32[16,512], index: 1, kind: input, shape index: {}]   ;;  %s385_s2 = inlined_call_operand.hbm [shape: f32[16,512], index: 2, kind: input, shape index: {}]   ;;  %s386_s3 = inlined_call_operand.hbm [shape: f32[16,512], index: 3, kind: input, shape index: {}]   ;;  %s387_s4 = inlined_call_operand.hbm [shape: f32[16,512], index: 4, kind: output, shape index: {}]  }
   0x1   :  { %s166_s17 = scalar_lea.hbm %s383_s0, 16 }
   0x2   :  { %p167_p0 = scmp.ne.s32.totalorder %s383_s0, %s166_s17  ;;  %p170_p1 = scmp.lt.u32.totalorder %s166_s17, %s383_s0 }
   0x4   :  { %p172_p2 = pnand %p170_p1, %p167_p0 }
   0x6   :  { %175 = shalt.err (!%p172_p2)  }
   0x7   :  { %s272_s22 = smov [#allocation3]  }
   0x8   :  { %10 = dma.hbm_to_smem %s383_s0, 16, %s272_s22, [#allocation2] }
   0x9   :  { %264 = dma.done.wait [#allocation2], 16 }
   0xa   :  { %265 = vsyncadd [#allocation2], 4294967280 }
   0xb   :  { %12 = sfence }
   0xc   :  { %13 = vsyncpa [#allocation5], 0 }
   0xd   :  { %14 = vsyncpa [#allocation8], 0 }
   0xe   :  { %15 = vsyncpa [#allocation6], 0  ;;  %s273_s25 = smov [#allocation7]   ;;  %s274_s27 = smov [#allocation4]  }
   0xf   :  { %s33_s26 = sshll.u32 %s273_s25, 4  ;;  %s21_s28 = sshll.u32 %s274_s27, 4  ;;  %s34_s26 = int_to_ptr.vmem [resolvable:$true] %s33_s26  ;;  %s316_s28 = int_to_ptr.vmem [resolvable:$true] %s21_s28 }
  0x10   :  { %s176_s5 = scalar_lea.hbm %s385_s2, 1024 }
  0x11   :  { %p177_p3 = scmp.ne.s32.totalorder %s385_s2, %s176_s5  ;;  %p180_p4 = scmp.lt.u32.totalorder %s176_s5, %s385_s2 }
  0x13   :  { %p182_p5 = pnand %p180_p4, %p177_p3 }
  0x15   :  { %185 = shalt.err (!%p182_p5)
}
  0x16   :  { %s186_s9 = scalar_lea.vmem %s34_s26, 1024  ;;  %p191_p7 = scmp.lt.s32.totalorder %s34_s26, %s34_s26 }
  0x17   :  { %p187_p6 = scmp.ne.s32.totalorder %s34_s26, %s186_s9  ;;  %p192_p8 = scmp.lt.s32.totalorder %s186_s9, %s186_s9 }
  0x19   :  { %p193_p9 = por %p192_p8, %p191_p7 }
  0x1b   :  { %p194_p10 = pnand %p193_p9, %p187_p6 }
  0x1d   :  { %197 = shalt.err (!%p194_p10)
}
  0x1e   :  { %s275_s10 = smov 512   ;;  %s276_s11 = smov 32  }
  0x1f   :  { %39 = dma.hbm_to_vmem [thread:$0]  %s385_s2, 1024, %s34_s26, [#allocation8], %s275_s10, %s275_s10, %s276_s11  }
  0x20   :  { %s198_s16 = scalar_lea.hbm %s384_s1, 1024 }
  0x21   :  { %p199_p11 = scmp.ne.s32.totalorder %s384_s1, %s198_s16  ;;  %p202_p12 = scmp.lt.u32.totalorder %s198_s16, %s384_s1 }
  0x23   :  { %p204_p13 = pnand %p202_p12, %p199_p11 }
  0x25   :  { %207 = shalt.err (!%p204_p13)
}
  0x26   :  { %s208_s21 = scalar_lea.vmem %s316_s28, 1024  ;;  %p213_p1 = scmp.lt.s32.totalorder %s316_s28, %s316_s28 }
  0x27   :  { %p209_p0 = scmp.ne.s32.totalorder %s316_s28, %s208_s21  ;;  %p214_p2 = scmp.lt.s32.totalorder %s208_s21, %s208_s21 }
  0x29   :  { %p215_p3 = por %p214_p2, %p213_p1 }
  0x2b   :  { %p216_p4 = pnand %p215_p3, %p209_p0 }
  0x2d   :  { %219 = shalt.err (!%p216_p4)
}
  0x2e   :  { %27 = dma.hbm_to_vmem [thread:$0]  %s384_s1, 1024, %s316_s28, [#allocation5], %s275_s10, %s275_s10, %s276_s11  }
  0x2f   :  { %s277_s23 = smov [#allocation9]   ;;  %s220_s27 = scalar_lea.hbm %s386_s3, 1024 }
  0x30   :  { %s45_s24 = sshll.u32 %s277_s23, 4  ;;  %p221_p5 = scmp.ne.s32.totalorder %s386_s3, %s220_s27  ;;  %s46_s24 = int_to_ptr.vmem [resolvable:$true] %s45_s24 }
  0x31   :  { %p224_p6 = scmp.lt.u32.totalorder %s220_s27, %s386_s3 }
  0x33   :  { %p226_p7 = pnand %p224_p6, %p221_p5 }
  0x35   :  { %229 = shalt.err (!%p226_p7)
}
  0x36   :  { %s230_s7 = scalar_lea.vmem %s46_s24, 1024  ;;  %p235_p9 = scmp.lt.s32.totalorder %s46_s24, %s46_s24 }
  0x37   :  { %p231_p8 = scmp.ne.s32.totalorder %s46_s24, %s230_s7  ;;  %p236_p10 = scmp.lt.s32.totalorder %s230_s7, %s230_s7 }
  0x39   :  { %p237_p11 = por %p236_p10, %p235_p9 }
  0x3b   :  { %p238_p12 = pnand %p237_p11, %p231_p8 }
  0x3d   :  { %241 = shalt.err (!%p238_p12)
}
  0x3e   :  { %51 = dma.hbm_to_vmem [thread:$0]  %s386_s3, 1024, %s46_s24, [#allocation8], %s275_s10, %s275_s10, %s276_s11  }
  0x3f   :  { %266 = dma.done.wait [#allocation5], 1024  }
  0x40   :  { %267 = vsyncadd [#allocation5], 4294966272 }
  0x41   :  { %268 = dma.done.wait [#allocation8], 2048  }
  0x42   :  { %269 = vsyncadd [#allocation8], 4294965248  ;;  %s85_s0 = sld [smem:[#allocation3]]  ;;  %s157_s8 = sld [smem:[#allocation3 + $0x1]]  ;;  %v61_v0 = vld [vmem:[#allocation7] sm:$0xff]  ;;  %v62_v8 = vld [vmem:[#allocation7 + $0x8] sm:$0xff] }
  0x43   :  { %s158_s9 = sld [smem:[#allocation3 + $0x2]]  ;;  %v69_v1 = vld [vmem:[#allocation4] sm:$0xff]  ;;  %v70_v9 = vld [vmem:[#allocation4 + $0x8] sm:$0xff]  ;;  %v63_v15 = vld [vmem:[#allocation7 + $0x10] sm:$0xff]  ;;  %s278_s3 = smov [#allocation10]  }
  0x44   :  { %v77_v2 = vld [vmem:[#allocation9] sm:$0xff]  ;;  %v78_v10 = vld [vmem:[#allocation9 + $0x8] sm:$0xff]  ;;  %v71_v16 = vld [vmem:[#allocation4 + $0x10] sm:$0xff]  ;;  %s144_s12 = sshll.u32 %s278_s3, 4  ;;  %s145_s12 = int_to_ptr.vmem [resolvable:$true] %s144_s12 }
  0x45   :  { %v79_v17 = vld [vmem:[#allocation9 + $0x10] sm:$0xff]  ;;  %v64_v22 = vld [vmem:[#allocation7 + $0x18] sm:$0xff]  ;;  %v65_v29 = vld [vmem:[#allocation7 + $0x20] sm:$0xff]  ;;  %s242_s13 = scalar_lea.vmem %s145_s12, 1024  ;;  %p247_p0 = scmp.lt.s32.totalorder %s145_s12, %s145_s12 }
  0x46   :  { %v72_v23 = vld [vmem:[#allocation4 + $0x18] sm:$0xff]  ;;  %v73_v30 = vld [vmem:[#allocation4 + $0x20] sm:$0xff]  ;;  %v66_v36 = vld [vmem:[#allocation7 + $0x28] sm:$0xff]  ;;  %p243_p13 = scmp.ne.s32.totalorder %s145_s12, %s242_s13  ;;  %p248_p1 = scmp.lt.s32.totalorder %s242_s13, %s242_s13 }
  0x47   :  { %v80_v24 = vld [vmem:[#allocation9 + $0x18] sm:$0xff]  ;;  %v81_v31 = vld [vmem:[#allocation9 + $0x20] sm:$0xff]  ;;  %v74_v37 = vld [vmem:[#allocation4 + $0x28] sm:$0xff] }
  0x48   :  { %v86_v3 = vstv %s85_s0  ;;  %v96_v4 = vstv %s157_s8  ;;  %v82_v38 = vld [vmem:[#allocation9 + $0x28] sm:$0xff]  ;;  %v67_v43 = vld [vmem:[#allocation7 + $0x30] sm:$0xff]  ;;  %v68_v50 = vld [vmem:[#allocation7 + $0x38] sm:$0xff]  ;;  %p249_p2 = por %p248_p1, %p247_p0 }
  0x49   :  { %v87_v5 = vmul.f32 %v86_v3, %v61_v0  ;;  %v97_v6 = vmul.f32 %v96_v4, %v69_v1  ;;  %v114_v7 = vstv %s158_s9  ;;  %v88_v12 = vmul.f32 %v86_v3, %v62_v8  ;;  %v75_v44 = vld [vmem:[#allocation4 + $0x30] sm:$0xff]  ;;  %v76_v51 = vld [vmem:[#allocation4 + $0x38] sm:$0xff] }
  0x4a   :  { %v115_v11 = vmul.f32 %v114_v7, %v77_v2  ;;  %v98_v13 = vmul.f32 %v96_v4, %v70_v9  ;;  %v116_v14 = vmul.f32 %v114_v7, %v78_v10  ;;  %v89_v19 = vmul.f32 %v86_v3, %v63_v15  ;;  %v83_v45 = vld [vmem:[#allocation9 + $0x30] sm:$0xff]  ;;  %v84_v52 = vld [vmem:[#allocation9 + $0x38] sm:$0xff]  ;;  %p250_p3 = pnand %p249_p2, %p243_p13 }
  0x4b   :  { %v105_v18 = vadd.f32 %v97_v6, %v87_v5  ;;  %v99_v20 = vmul.f32 %v96_v4, %v71_v16  ;;  %v117_v21 = vmul.f32 %v114_v7, %v79_v17  ;;  %v90_v26 = vmul.f32 %v86_v3, %v64_v22 }
  0x4c   :  { %v106_v25 = vadd.f32 %v98_v13, %v88_v12  ;;  %v100_v27 = vmul.f32 %v96_v4, %v72_v23  ;;  %v118_v28 = vmul.f32 %v114_v7, %v80_v24  ;;  %v91_v34 = vmul.f32 %v86_v3, %v65_v29 }
  0x4d   :  { %v123_v32 = vadd.f32 %v115_v11, %v105_v18  ;;  %v107_v33 = vadd.f32 %v99_v20, %v89_v19  ;;  %v101_v35 = vmul.f32 %v96_v4, %v73_v30  ;;  %v119_v41 = vmul.f32 %v114_v7, %v81_v31 }
  0x4e   :  { %v124_v39 = vadd.f32 %v116_v14, %v106_v25  ;;  %v108_v40 = vadd.f32 %v100_v27, %v90_v26  ;;  %v92_v42 = vmul.f32 %v86_v3, %v66_v36  ;;  %v102_v48 = vmul.f32 %v96_v4, %v74_v37 }
  0x4f   :  { %131 = vst [vmem:[#allocation10] sm:$0xff] %v123_v32  ;;  %v125_v46 = vadd.f32 %v117_v21, %v107_v33  ;;  %v109_v47 = vadd.f32 %v101_v35, %v91_v34  ;;  %v120_v49 = vmul.f32 %v114_v7, %v82_v38  ;;  %v93_v54 = vmul.f32 %v86_v3, %v67_v43 }
  0x50   :  { %132 = vst [vmem:[#allocation10 + $0x8] sm:$0xff] %v124_v39  ;;  %v126_v53 = vadd.f32 %v118_v28, %v108_v40  ;;  %v103_v55 = vmul.f32 %v96_v4, %v75_v44  ;;  %v121_v56 = vmul.f32 %v114_v7, %v83_v45  ;;  %v110_v58 = vadd.f32 %v102_v48, %v92_v42 }
  0x51   :  { %133 = vst [vmem:[#allocation10 + $0x10] sm:$0xff] %v125_v46  ;;  %v127_v57 = vadd.f32 %v119_v41, %v109_v47  ;;  %v94_v59 = vmul.f32 %v86_v3, %v68_v50  ;;  %v104_v60 = vmul.f32 %v96_v4, %v76_v51  ;;  %v122_v62 = vmul.f32 %v114_v7, %v84_v52 }
  0x52   :  { %134 = vst [vmem:[#allocation10 + $0x18] sm:$0xff] %v126_v53  ;;  %v111_v61 = vadd.f32 %v103_v55, %v93_v54  ;;  %v128_v63 = vadd.f32 %v120_v49, %v110_v58 }
  0x53   :  { %135 = vst [vmem:[#allocation10 + $0x20] sm:$0xff] %v127_v57  ;;  %v112_v0 = vadd.f32 %v104_v60, %v94_v59 }
  0x54   :  { %v129_v1 = vadd.f32 %v121_v56, %v111_v61  ;;  %136 = vst [vmem:[#allocation10 + $0x28] sm:$0xff] %v128_v63 }
  0x55   :  { %v130_v2 = vadd.f32 %v122_v62, %v112_v0 }
  0x56   :  { %137 = vst [vmem:[#allocation10 + $0x30] sm:$0xff] %v129_v1 }
  0x57   :  { %138 = vst [vmem:[#allocation10 + $0x38] sm:$0xff] %v130_v2 }
  0x58   :  { %253 = shalt.err (!%p250_p3)
}
  0x59   :  { %s254_s16 = scalar_lea.hbm %s387_s4, 1024 }
  0x5a   :  { %p255_p4 = scmp.ne.s32.totalorder %s387_s4, %s254_s16  ;;  %p258_p5 = scmp.lt.u32.totalorder %s254_s16, %s387_s4 }
  0x5c   :  { %p260_p6 = pnand %p258_p5, %p255_p4 }
  0x5e   :  { %263 = shalt.err (!%p260_p6)
}
  0x5f   :  { %150 = dma.vmem_to_hbm [thread:$0]  %s145_s12, 1024, %s387_s4, [#allocation6], %s275_s10, %s275_s10, %s276_s11  }
  0x60   :  { %270 = dma.done.wait [#allocation6], 1024  }
  0x61   :  { %271 = vsyncadd [#allocation6], 4294966272 }
  0x62   :  { %154 = vsyncpa [#allocation5], 1 }
  0x63   :  { %155 = vsyncpa [#allocation8], 1 }
  0x64   :  { %156 = vsyncpa [#allocation6], 1 }

</bundles_post_ra>
